<compile_context>
chip_gen: v7x
topology: tpu7x:2x2x1
jax: 0.10.0
libtpu: 0.0.40
codegen_flags: <defaults>
</compile_context>

<pallas_src>
import functools

import jax
import jax.numpy as jnp
from jax import lax
from jax.experimental import pallas as pl
from jax.experimental.pallas import tpu as pltpu


def _round_up(x: int, m: int) -> int:
    return ((x + m - 1) // m) * m


def _mlp_kernel(x_ref, w1_ref, b1_ref, w2_ref, b2_ref, w3_ref, b3_ref,
                o_ref, *, binary_A: bool, compute_dtype):
    """One batch-tile of the full MLP. Output row is lane-dense (1, 1, tile_b)."""
    # X arrives as f32 from HBM; cast to the compute dtype on-chip (no-op for f32).
    x = x_ref[...].astype(compute_dtype)                # (TB, D)

    # Layer 1 (MXU): (TB, D) @ (D, 128) -> f32 accumulate, then bias + ReLU in f32.
    h1 = jnp.dot(x, w1_ref[...], preferred_element_type=jnp.float32)
    h1 = jnp.maximum(h1 + b1_ref[...], 0.0)             # (TB, 128) f32

    # Layer 2 (MXU): (TB, 128) @ (128, 64) -> f32.
    h2 = jnp.dot(h1.astype(w2_ref.dtype), w2_ref[...],
                 preferred_element_type=jnp.float32)
    h2 = jnp.maximum(h2 + b2_ref[...], 0.0)             # (TB, 64) f32

    # Layer 3: transposed formulation (1,64)·(TB,64)^T -> (1, TB) lane-dense row.
    # (Avoids an N=1 MXU matmul and directly matches the lane-dense output layout.)
    out_row = lax.dot_general(
        w3_ref[...], h2.astype(w3_ref.dtype),
        dimension_numbers=(((1,), (1,)), ((), ())),
        preferred_element_type=jnp.float32)              # (1, TB) f32
    out_row = out_row + b3_ref[0]                        # scalar bias from SMEM

    if binary_A:
        out_row = jax.nn.sigmoid(out_row)                # EUP, f32

    o_ref[...] = out_row.reshape(o_ref.shape).astype(o_ref.dtype)


def _choose_tile_b(B: int, D: int, itemsize: int) -> int:
    """VMEM-budgeted batch tile, lane/sublane friendly, >=2 tiles for large B."""
    # Per-row VMEM estimate: double-buffered f32 X tile + f32 h1/h2 + compute-dtype
    # casts of x/h1/h2 + lane-dense out row.  Keep the total near ~8 MiB so it fits
    # every generation's scoped-VMEM default with plenty of headroom.
    per_row = 2 * D * 4 + (128 + 64) * 4 + (D + 128 + 64) * itemsize + 16
    budget = 8 * 1024 * 1024
    cap = max(128, min(4096, (budget // per_row) // 128 * 128))

    if B < 256:
        # Tiny batch: one tile; round to 128 lanes once B >= 128 (unmasked vst),
        # otherwise to the 8-row sublane granule.
        granule = 128 if B >= 128 else 8
        return _round_up(B, granule)

    # Large batch: biggest tile under the cap, but never a single tile — keep at
    # least 2 grid steps so v7x's two TensorCores both get work.
    half = _round_up((B + 1) // 2, 128)
    return min(cap, half)


def nuisance_model_a_forward(X, params, *, binary_A=False, tile_b=None,
                             compute_dtype=jnp.float32):
    """Pallas forward pass of NuisanceModelA.

    X:      (B, D) float32
    params: dict with w1 (D,128), b1 (128,), w2 (128,64), b2 (64,), w3 (64,1), b3 (1,)
    returns (B,) float32   (matches torch .squeeze() for B > 1;
                            for B == 1 this returns shape (1,), not a 0-d scalar)
    """
    B, D = X.shape
    compute_dtype = jnp.dtype(compute_dtype)
    itemsize = compute_dtype.itemsize

    if tile_b is None:
        tile_b = _choose_tile_b(B, D, itemsize)
    assert tile_b % 8 == 0, "tile_b must be a multiple of 8 (sublane tiling)"

    # Pad batch so it divides the tile; padded rows are sliced off at the end.
    # NOTE: X stays float32 — no wrapper-side dtype cast (cast happens in-kernel).
    B_pad = _round_up(B, tile_b)
    if B_pad != B:
        X = jnp.pad(X, ((0, B_pad - B), (0, 0)))
    num_tiles = B_pad // tile_b

    # Weights (tiny) cast to the compute dtype at the boundary; biases stay f32 so
    # all element-wise math is f32 (required on v5e, harmless elsewhere).
    w1 = params["w1"].astype(compute_dtype)                       # (D, 128)
    w2 = params["w2"].astype(compute_dtype)                       # (128, 64)
    w3 = params["w3"].reshape(1, 64).astype(compute_dtype)        # (1, 64) row
    b1 = params["b1"].reshape(1, 128).astype(jnp.float32)
    b2 = params["b2"].reshape(1, 64).astype(jnp.float32)
    b3 = params["b3"].reshape(1).astype(jnp.float32)              # (1,) scalar -> SMEM

    kernel = functools.partial(_mlp_kernel, binary_A=binary_A,
                               compute_dtype=compute_dtype)

    weight_bytes = (D * 128 + 128 * 64 + 64) * itemsize + (128 + 64 + 1) * 4
    cost = pl.CostEstimate(
        flops=2 * B_pad * (D * 128 + 128 * 64 + 64),
        transcendentals=B_pad if binary_A else 0,
        bytes_accessed=B_pad * (D * 4 + 4) + weight_bytes,
    )

    out = pl.pallas_call(
        kernel,
        out_shape=jax.ShapeDtypeStruct((num_tiles, 1, tile_b), jnp.float32),
        grid_spec=pltpu.PrefetchScalarGridSpec(
            num_scalar_prefetch=0,
            grid=(num_tiles,),
            in_specs=[
                pl.BlockSpec((tile_b, D), lambda i: (i, 0)),         # X tile (pipelined)
                pl.BlockSpec((D, 128),    lambda i: (0, 0)),         # w1 (grid-invariant)
                pl.BlockSpec((1, 128),    lambda i: (0, 0)),         # b1
                pl.BlockSpec((128, 64),   lambda i: (0, 0)),         # w2
                pl.BlockSpec((1, 64),     lambda i: (0, 0)),         # b2
                pl.BlockSpec((1, 64),     lambda i: (0, 0)),         # w3 row
                pl.BlockSpec(memory_space=pltpu.MemorySpace.SMEM),   # b3 scalar
            ],
            # Lane-dense output row per grid step (unmasked vst for tile_b % 128 == 0).
            out_specs=pl.BlockSpec((1, 1, tile_b), lambda i: (i, 0, 0)),
        ),
        compiler_params=pltpu.CompilerParams(
            dimension_semantics=("parallel",),
            vmem_limit_bytes=32 * 1024 * 1024),
        cost_estimate=cost,
    )(X, w1, b1, w2, b2, w3, b3)

    # Shape plumbing outside the kernel: slab -> (B,) (.squeeze() equivalent for B > 1).
    return out.reshape(B_pad)[:B]


def init_params(key, input_dim):
    """Deterministic init matching nn.Linear shapes (stored transposed)."""
    k1, k2, k3, k4, k5, k6 = jax.random.split(key, 6)

    def uniform(k, shape, fan_in):
        bound = 1.0 / jnp.sqrt(fan_in)
        return jax.random.uniform(k, shape, jnp.float32, -bound, bound)

    return {
        "w1": uniform(k1, (input_dim, 128), input_dim),
        "b1": uniform(k2, (128,), input_dim),
        "w2": uniform(k3, (128, 64), 128),
        "b2": uniform(k4, (64,), 128),
        "w3": uniform(k5, (64, 1), 64),
        "b3": uniform(k6, (1,), 64),
    }


def _reference(X, p, binary_A):
    hp = lax.Precision.HIGHEST
    h = jnp.maximum(jnp.dot(X, p["w1"], precision=hp) + p["b1"], 0.0)
    h = jnp.maximum(jnp.dot(h, p["w2"], precision=hp) + p["b2"], 0.0)
    o = (jnp.dot(h, p["w3"], precision=hp) + p["b3"]).squeeze()
    return jax.nn.sigmoid(o) if binary_A else o


if __name__ == "__main__":
    key = jax.random.PRNGKey(0)
    k_x, k_p, k_x2, k_x3 = jax.random.split(key, 4)

    D = 32
    params = init_params(k_p, D)

    # --- Test 1: small batch, default f32 compute, continuous A --------------
    B1 = 8
    X1 = jax.random.normal(k_x, (B1, D), jnp.float32)
    out1 = nuisance_model_a_forward(X1, params, binary_A=False)
    jax.block_until_ready(out1)
    ref1 = _reference(X1, params, False)
    assert out1.shape == (B1,)
    assert jnp.allclose(out1, ref1, atol=1e-3, rtol=1e-3)

    # --- Test 2: binary A (sigmoid in-kernel), f32 compute -------------------
    out2 = nuisance_model_a_forward(X1, params, binary_A=True)
    jax.block_until_ready(out2)
    ref2 = _reference(X1, params, True)
    assert jnp.allclose(out2, ref2, atol=1e-3, rtol=1e-3)

    # --- Test 3: non-divisible batch, multi-step grid, bf16 compute path -----
    B3 = 20
    X3 = jax.random.normal(k_x2, (B3, D), jnp.float32)
    out3 = nuisance_model_a_forward(X3, params, binary_A=True, tile_b=8,
                                    compute_dtype=jnp.bfloat16)
    jax.block_until_ready(out3)
    ref3 = _reference(X3, params, True)
    assert out3.shape == (B3,)
    assert jnp.allclose(out3, ref3, atol=3e-2, rtol=3e-2)

    # --- Test 4: auto tile heuristic (>=2 tiles, 128-aligned, padded tail) ---
    B4 = 300
    X4 = jax.random.normal(k_x3, (B4, D), jnp.float32)
    out4 = nuisance_model_a_forward(X4, params, binary_A=False)
    jax.block_until_ready(out4)
    ref4 = _reference(X4, params, False)
    assert out4.shape == (B4,)
    assert jnp.allclose(out4, ref4, atol=1e-3, rtol=1e-3)

    print("KERNEL_OK")
</pallas_src>

<mosaic_0001>
module attributes {stable_mosaic.version = 11 : i64} {
  func.func @_mlp_kernel(%arg0: i32, %arg1: memref<8x32xf32, #tpu.memory_space<vmem>>, %arg2: memref<32x128xf32, #tpu.memory_space<vmem>>, %arg3: memref<1x128xf32, #tpu.memory_space<vmem>>, %arg4: memref<128x64xf32, #tpu.memory_space<vmem>>, %arg5: memref<1x64xf32, #tpu.memory_space<vmem>>, %arg6: memref<1x64xf32, #tpu.memory_space<vmem>>, %arg7: memref<1xf32, #tpu.memory_space<smem>>, %arg8: memref<1x1x8xf32, #tpu.memory_space<vmem>>) attributes {dimension_semantics = [#tpu.dimension_semantics<parallel>], iteration_bounds = array<i64: 1>, scalar_prefetch = 0 : i64, scratch_operands = 0 : i64, tpu.core_type = #tpu.core_type<tc>, window_params = [{transform_indices = @transform_0, window_bounds = array<i64: 8, 32>}, {pipeline_mode = #tpu.pipeline_mode<synchronous>, transform_indices = @transform_1, window_bounds = array<i64: 32, 128>}, {pipeline_mode = #tpu.pipeline_mode<synchronous>, transform_indices = @transform_2, window_bounds = array<i64: 1, 128>}, {pipeline_mode = #tpu.pipeline_mode<synchronous>, transform_indices = @transform_3, window_bounds = array<i64: 128, 64>}, {pipeline_mode = #tpu.pipeline_mode<synchronous>, transform_indices = @transform_4, window_bounds = array<i64: 1, 64>}, {pipeline_mode = #tpu.pipeline_mode<synchronous>, transform_indices = @transform_5, window_bounds = array<i64: 1, 64>}, {transform_indices = @transform_6, window_bounds = array<i64: 1>}, {transform_indices = @transform_7, window_bounds = array<i64: 1, 1, 8>}]} {
    %c0 = arith.constant 0 : index
    %c0_0 = arith.constant 0 : index
    %0 = vector.load %arg1[%c0, %c0_0] : memref<8x32xf32, #tpu.memory_space<vmem>>, vector<8x32xf32>
    %c0_1 = arith.constant 0 : index
    %c0_2 = arith.constant 0 : index
    %1 = vector.load %arg2[%c0_1, %c0_2] : memref<32x128xf32, #tpu.memory_space<vmem>>, vector<32x128xf32>
    %cst = arith.constant dense<0.000000e+00> : vector<8x128xf32>
    %2 = tpu.matmul %0, %1, %cst {dimension_numbers = #tpu.dot_dimension_numbers<[1], [0], [0], [1], [0, 0, 1, 1], [], []>} : vector<8x32xf32>, vector<32x128xf32>, vector<8x128xf32> -> vector<8x128xf32>
    %c0_3 = arith.constant 0 : index
    %c0_4 = arith.constant 0 : index
    %3 = vector.load %arg3[%c0_3, %c0_4] : memref<1x128xf32, #tpu.memory_space<vmem>>, vector<1x128xf32>
    %4 = vector.broadcast %3 : vector<1x128xf32> to vector<8x128xf32>
    %5 = arith.addf %2, %4 : vector<8x128xf32>
    %cst_5 = arith.constant 0.000000e+00 : f32
    %6 = vector.broadcast %cst_5 : f32 to vector<8x128xf32>
    %7 = arith.maximumf %5, %6 : vector<8x128xf32>
    %c0_6 = arith.constant 0 : index
    %c0_7 = arith.constant 0 : index
    %8 = vector.load %arg4[%c0_6, %c0_7] : memref<128x64xf32, #tpu.memory_space<vmem>>, vector<128x64xf32>
    %cst_8 = arith.constant dense<0.000000e+00> : vector<8x64xf32>
    %9 = tpu.matmul %7, %8, %cst_8 {dimension_numbers = #tpu.dot_dimension_numbers<[1], [0], [0], [1], [0, 0, 1, 1], [], []>} : vector<8x128xf32>, vector<128x64xf32>, vector<8x64xf32> -> vector<8x64xf32>
    %c0_9 = arith.constant 0 : index
    %c0_10 = arith.constant 0 : index
    %10 = vector.load %arg5[%c0_9, %c0_10] : memref<1x64xf32, #tpu.memory_space<vmem>>, vector<1x64xf32>
    %11 = vector.broadcast %10 : vector<1x64xf32> to vector<8x64xf32>
    %12 = arith.addf %9, %11 : vector<8x64xf32>
    %cst_11 = arith.constant 0.000000e+00 : f32
    %13 = vector.broadcast %cst_11 : f32 to vector<8x64xf32>
    %14 = arith.maximumf %12, %13 : vector<8x64xf32>
    %c0_12 = arith.constant 0 : index
    %c0_13 = arith.constant 0 : index
    %15 = vector.load %arg6[%c0_12, %c0_13] : memref<1x64xf32, #tpu.memory_space<vmem>>, vector<1x64xf32>
    %cst_14 = arith.constant dense<0.000000e+00> : vector<1x8xf32>
    %16 = tpu.matmul %15, %14, %cst_14 {dimension_numbers = #tpu.dot_dimension_numbers<[1], [1], [0], [0], [0, 0, 1, 0], [], []>} : vector<1x64xf32>, vector<8x64xf32>, vector<1x8xf32> -> vector<1x8xf32>
    %c0_15 = arith.constant 0 : index
    %17 = memref.load %arg7[%c0_15] : memref<1xf32, #tpu.memory_space<smem>>
    %18 = vector.broadcast %17 : f32 to vector<1x8xf32>
    %19 = arith.addf %16, %18 : vector<1x8xf32>
    %20 = vector.shape_cast %19 : vector<1x8xf32> to vector<1x1x8xf32>
    %c0_16 = arith.constant 0 : index
    %c0_17 = arith.constant 0 : index
    %c0_18 = arith.constant 0 : index
    %21 = vector.load %arg8[%c0_16, %c0_17, %c0_18] : memref<1x1x8xf32, #tpu.memory_space<vmem>>, vector<1x1x8xf32>
    tpu.vector_store %arg8[%c0_16, %c0_17, %c0_18], %20 {strides = array<i32>} : memref<1x1x8xf32, #tpu.memory_space<vmem>>, vector<1x1x8xf32>,
    return
  }
  func.func @transform_0(%arg0: i32) -> (i32, i32) {
    %c0_i32 = arith.constant 0 : i32
    %c0_i32_0 = arith.constant 0 : i32
    return %arg0, %c0_i32 : i32, i32
  }
  func.func @transform_1(%arg0: i32) -> (i32, i32) {
    %c0_i32 = arith.constant 0 : i32
    %c0_i32_0 = arith.constant 0 : i32
    %c0_i32_1 = arith.constant 0 : i32
    return %c0_i32, %c0_i32_0 : i32, i32
  }
  func.func @transform_2(%arg0: i32) -> (i32, i32) {
    %c0_i32 = arith.constant 0 : i32
    %c0_i32_0 = arith.constant 0 : i32
    %c0_i32_1 = arith.constant 0 : i32
    return %c0_i32, %c0_i32_0 : i32, i32
  }
  func.func @transform_3(%arg0: i32) -> (i32, i32) {
    %c0_i32 = arith.constant 0 : i32
    %c0_i32_0 = arith.constant 0 : i32
    %c0_i32_1 = arith.constant 0 : i32
    return %c0_i32, %c0_i32_0 : i32, i32
  }
  func.func @transform_4(%arg0: i32) -> (i32, i32) {
    %c0_i32 = arith.constant 0 : i32
    %c0_i32_0 = arith.constant 0 : i32
    %c0_i32_1 = arith.constant 0 : i32
    return %c0_i32, %c0_i32_0 : i32, i32
  }
  func.func @transform_5(%arg0: i32) -> (i32, i32) {
    %c0_i32 = arith.constant 0 : i32
    %c0_i32_0 = arith.constant 0 : i32
    %c0_i32_1 = arith.constant 0 : i32
    return %c0_i32, %c0_i32_0 : i32, i32
  }
  func.func @transform_6(%arg0: i32) -> i32 {
    %c0_i32 = arith.constant 0 : i32
    %c0_i32_0 = arith.constant 0 : i32
    return %c0_i32 : i32
  }
  func.func @transform_7(%arg0: i32) -> (i32, i32, i32) {
    %c0_i32 = arith.constant 0 : i32
    %c0_i32_0 = arith.constant 0 : i32
    %c0_i32_1 = arith.constant 0 : i32
    return %arg0, %c0_i32, %c0_i32_0 : i32, i32, i32
  }
}

</mosaic_0001>

<bundles_post_ra>
// kernel: tpu_custom_call.1
= control target key start
LH: loop header
LB: loop body
LE: loop exit
PB: predicated region body
PF: predicated region fallthrough
CT: control target
= control target key end

     0   :  { %v443_v3 = vmov 0.0|0.0   ;;  %vm444_vm0 = vmmov 0   ;;  %v445_v6 = vmov 0.0   ;;  %s577_s0 = inlined_call_operand.vmem [shape: f32[8,32], index: 0, kind: input, shape index: {}]   ;;  %s578_s1 = inlined_call_operand.vmem [shape: f32[32,128], index: 1, kind: input, shape index: {}]   ;;  %s579_s2 = inlined_call_operand.vmem [shape: f32[1,128], index: 2, kind: input, shape index: {}]   ;;  %s580_s3 = inlined_call_operand.vmem [shape: f32[128,64], index: 3, kind: input, shape index: {}]   ;;  %s581_s4 = inlined_call_operand.vmem [shape: f32[1,64], index: 4, kind: input, shape index: {}]   ;;  %s582_s5 = inlined_call_operand.vmem [shape: f32[1,64], index: 5, kind: input, shape index: {}]   ;;  %s583_s6 = inlined_call_operand.<no memory space> [shape: f32[1], index: 6, kind: input, shape index: {}]   ;;  %s584_s7 = inlined_call_operand.hbm [shape: f32[1,1,8], index: 7, kind: output, shape index: {}]  }
   0x1   :  { %v29_v0 = vld [vmem:[%s578_s1] sm:$0xff]  ;;  %v30_v1 = vld [vmem:[%s578_s1 + $0x8] sm:$0xff]  ;;  %v31_v2 = vld [vmem:[%s578_s1 + $0x10] sm:$0xff]  ;;  %385 = vmatprep.subr.bf16.mxu0 %v443_v3  ;;  %342 = vmatprep.mubr.msk.f32.mxu0 %vm444_vm0, %v445_v6 }
   0x2   :  { %v386_v4 = vpack.c.bf16 %v30_v1, %v29_v0  ;;  %v32_v5 = vld [vmem:[%s578_s1 + $0x18] sm:$0xff]  ;;  %v115_v7 = vld [vmem:[%s580_s3] sm:$0xff]  ;;  %391 = vmatprep.subr.bf16.mxu1 %v443_v3  ;;  %v116_v8 = vld [vmem:[%s580_s3 + $0x8] sm:$0xff]  ;;  %377 = vmatprep.mubr.msk.f32.mxu1 %vm444_vm0, %v445_v6 }
   0x3   :  { %v117_v9 = vld [vmem:[%s580_s3 + $0x10] sm:$0xff]  ;;  %v118_v10 = vld [vmem:[%s580_s3 + $0x18] sm:$0xff]  ;;  %v389_v11 = vpack.c.bf16 %v32_v5, %v31_v2  ;;  %v392_v12 = vpack.c.bf16 %v116_v8, %v115_v7  ;;  %v119_v14 = vld [vmem:[%s580_s3 + $0x20] sm:$0xff] }
   0x4   :  { %387 = vmatpush3.bf16.msra.mxu0 %v386_v4  ;;  %v395_v13 = vpack.c.bf16 %v118_v10, %v117_v9  ;;  %v120_v15 = vld [vmem:[%s580_s3 + $0x28] sm:$0xff] }
   0x5   :  { %388 = vmatprep.subr.bf16.mxu0 %v443_v3  ;;  %393 = vmatpush3.bf16.msra.mxu1 %v392_v12 }
   0x6   :  { %394 = vmatprep.subr.bf16.mxu1 %v443_v3 }
   0x7   :  { %13 = vsyncpa [#allocation4], 0  ;;  %v28_v16 = vld [vmem:[%s577_s0] sm:$0xff]  ;;  %vm40_vm1 = vcmask 261120   ;;  %v398_v17 = vpack.c.bf16 %v120_v15, %v119_v14  ;;  %v121_v18 = vld [vmem:[%s580_s3 + $0x30] sm:$0xff]  ;;  %vm212_vm2 = vcmask 523264   ;;  %v211_v44 = vstv %s583_s6 }
   0x8   :  { %390 = vmatpush3.bf16.msra.mxu0 %v389_v11  ;;  %v122_v19 = vld [vmem:[%s580_s3 + $0x38] sm:$0xff]  ;;  %v123_v21 = vld [vmem:[%s580_s3 + $0x40] sm:$0xff]  ;;  %v124_v22 = vld [vmem:[%s580_s3 + $0x48] sm:$0xff]  ;;  %s446_s23 = smov [#allocation3]   ;;  %vm289_vm3 = vcmask 57344  }
   0x9   :  { %380 = vmatprep.subr.mxu0 %v445_v6  ;;  %396 = vmatpush3.bf16.msra.mxu1 %v395_v13  ;;  %v401_v20 = vpack.c.bf16 %v122_v19, %v121_v18  ;;  %v404_v23 = vpack.c.bf16 %v124_v22, %v123_v21  ;;  %v125_v24 = vld [vmem:[%s580_s3 + $0x50] sm:$0xff]  ;;  %v126_v25 = vld [vmem:[%s580_s3 + $0x58] sm:$0xff]  ;;  %v127_v27 = vld [vmem:[%s580_s3 + $0x60] sm:$0xff]  ;;  %s297_s24 = sshll.u32 %s446_s23, 4  ;;  %s298_s24 = int_to_ptr.vmem [resolvable:$true] %s297_s24 }
   0xa   :  { %397 = vmatprep.subr.bf16.mxu1 %v443_v3  ;;  %v407_v26 = vpack.c.bf16 %v126_v25, %v125_v24  ;;  %v128_v28 = vld [vmem:[%s580_s3 + $0x68] sm:$0xff]  ;;  %v129_v30 = vld [vmem:[%s580_s3 + $0x70] sm:$0xff]  ;;  %v130_v31 = vld [vmem:[%s580_s3 + $0x78] sm:$0xff]  ;;  %s423_s25 = scalar_lea.vmem %s298_s24, 32  ;;  %p424_p1 = scmp.lt.s32.totalorder %s298_s24, %s298_s24 }
   0xb   :  { %343 = vmatmul.mubr.msk.f32.vlgmr.msra.gmra.mrb[0].mxu0 %vm40_vm1, %v28_v16  ;;  %v410_v29 = vpack.c.bf16 %v128_v28, %v127_v27  ;;  %v413_v32 = vpack.c.bf16 %v130_v31, %v129_v30  ;;  %v305_v33 = vld [vmem:[%s579_s2] ss:$0 sm:$0xff] }
   0xc   :  { %382 = vmatprep.mubr.msk.f32.mxu0 %vm444_vm0, %v445_v6  ;;  %v307_v38 = vld [vmem:[%s581_s4] ss:$0 sm:$0xff]  ;;  %s419_s4 = scalar_lea.vmem %s298_s24, 16 }
   0xd   :  { %399 = vmatpush3.bf16.msra.mxu1 %v398_v17  ;;  %v209_v43 = vld [vmem:[%s582_s5] sm:$0x1]  ;;  %p420_p0 = scmp.ne.s32.totalorder %s298_s24, %s419_s4  ;;  %p425_p2 = scmp.lt.s32.totalorder %s423_s25, %s419_s4 }
   0xe   :  { %400 = vmatprep.subr.bf16.mxu1 %v443_v3 }
   0xf   :  { %p426_p3 = por %p425_p2, %p424_p1 }
  0x11   :  { %402 = vmatpush3.bf16.msra.mxu1 %v401_v20  ;;  %p427_p4 = pnand %p426_p3, %p420_p0 }
  0x12   :  { %403 = vmatprep.subr.bf16.mxu1 %v443_v3 }
  0x15   :  { %405 = vmatpush3.bf16.msra.mxu1 %v404_v23 }
  0x16   :  { %406 = vmatprep.subr.bf16.mxu1 %v443_v3 }
  0x19   :  { %408 = vmatpush3.bf16.msra.mxu1 %v407_v26 }
  0x1a   :  { %409 = vmatprep.subr.bf16.mxu1 %v443_v3 }
  0x1d   :  { %411 = vmatpush3.bf16.msra.mxu1 %v410_v29 }
  0x1e   :  { %412 = vmatprep.subr.bf16.mxu1 %v443_v3 }
  0x21   :  { %414 = vmatpush3.bf16.msra.mxu1 %v413_v32 }
  0xde   :  { %v110_v34 = vpop.f32.mrb[0].mxu0 }
  0xdf   :  { %v111_v35 = vadd.f32 %v305_v33, %v110_v34  ;;  %v344_v36 = vpop.f32.mrb[1].mxu0 }
  0xe1   :  { %v114_v37 = vmax.f32 %v111_v35, 0.0 }
  0xe3   :  { %378 = vmatmul.mubr.f32.vlgmr.msra.gmra.mrb[0].mxu1 %v114_v37 }
 0x1b6   :  { %v204_v39 = vpop.f32.mrb[0].mxu1 }
 0x1b7   :  { %v205_v40 = vadd.f32 %v307_v38, %v204_v39  ;;  %v379_v41 = vpop.f32.mrb[1].mxu1 }
 0x1b9   :  { %v208_v42 = vmax.f32 %v205_v40, 0.0 }
 0x1bb   :  { %381 = vmatpush3.xpose.msk.msra.mxu0 %vm212_vm2, %v208_v42 }
 0x1be   :  { %383 = vmatmul.mubr.msk.f32.vlgmr.msra.gmra.mrb[2].mxu0 %vm212_vm2, %v209_v43 }
 0x291   :  { %v285_v45 = vpop.f32.mrb[2].mxu0 }
 0x292   :  { %v286_v46 = vadd.f32 %v285_v45, %v211_v44  ;;  %v384_v47 = vpop.f32.mrb[3].mxu0 }
 0x294   :  { %290 = vst.msk [vmem:[#allocation3] sm:$0x1] %vm289_vm3, %v286_v46 }
 0x295   :  { %430 = shalt.err (!%p427_p4)
}
 0x296   :  { %s431_s6 = scalar_lea.hbm %s584_s7, 16 }
 0x297   :  { %p432_p5 = scmp.ne.s32.totalorder %s584_s7, %s431_s6  ;;  %p435_p6 = scmp.lt.u32.totalorder %s431_s6, %s584_s7 }
 0x299   :  { %p437_p7 = pnand %p435_p6, %p432_p5 }
 0x29b   :  { %440 = shalt.err (!%p437_p7)
}
 0x29c   :  { %300 = dma.vmem_to_hbm [thread:$0]  %s298_s24, 16, %s584_s7, [#allocation4]  }
 0x29d   :  { %441 = dma.done.wait [#allocation4], 16  }
 0x29e   :  { %442 = vsyncadd [#allocation4], 4294967280 }
 0x29f   :  { %304 = vsyncpa [#allocation4], 1 }

</bundles_post_ra>
